<compile_context>
chip_gen: v6e
topology: v6e:2x2x1
jax: 0.10.0
libtpu: 0.0.40
codegen_flags: <defaults>
</compile_context>

<pallas_src>
import functools

import jax
import jax.numpy as jnp
from jax import lax
from jax.experimental import pallas as pl
from jax.experimental.pallas import tpu as pltpu

EPS = 1e-5
NUM_LAYERS = 3
DIA = 2                        # dilation; autopad(3, None, 2) -> padding = 2
MATMUL_DTYPE = jnp.bfloat16    # MXU operand dtype (accumulation stays f32)
MAX_BATCH_TILE = 8             # cap on batch elements folded onto the lane axis


def _spatial_attention_kernel(x_ref, mask9_ref, w1_ref, wc_ref, wl_ref, b_ref,
                              o_ref, taps_ref, *, H, W, CP, B_TILE):
    # x_ref    : (1, C, S)      B_TILE batch elements, channel-major, S = B_TILE*H*W on lanes
    # mask9_ref: (9*CP, S)      per-tap border masks pre-broadcast over CP rows (0/1, f32)
    # w1_ref   : (CP, C)        conv_reduce1 weight (BN folded), bf16, rows >= Cm are 0
    # wc_ref   : (L, CP, 9*CP)  per-layer tap-stacked dilated-conv weights (BN folded), bf16
    # wl_ref   : (CP, 1)        last_conv weight (column vector), f32, rows >= Cm are 0
    # b_ref    : (L+2, CP, 1)   [b_reduce1, b_layer0..L-1, b_last (row 0)], f32
    # o_ref    : (1, 1, S)      attention map (pre-expand_as)
    # taps_ref : (9*CP, S)      VMEM scratch for the rolled tap stack
    S = B_TILE * H * W
    x = x_ref[0]                                                    # (C, S) bf16

    # conv_reduce1 (1x1, BN folded) + ReLU.  Padded rows Cm..CP-1 stay exactly 0.
    h = jnp.dot(w1_ref[...], x, preferred_element_type=jnp.float32)  # (CP, S) f32
    h = jnp.maximum(h + b_ref[0], 0.0)

    # 3 x (dilated 3x3 conv + folded BN + ReLU), roll-the-input formulation.
    for layer in range(NUM_LAYERS):
        # Spatial part: 9 static lane rolls of h (XLU), written into the tap stack.
        for tap in range(9):
            ky, kx = divmod(tap, 3)
            off = (ky - 1) * DIA * W + (kx - 1) * DIA
            rolled = h if off == 0 else pltpu.roll(h, (-off) % S, axis=1)
            taps_ref[tap * CP:(tap + 1) * CP, :] = rolled
        # Zero padding (and batch-boundary isolation) via one full-width mask mul,
        # then ONE channel-mixing MXU matmul with K = 9*CP.
        stacked = (taps_ref[...] * mask9_ref[...]).astype(MATMUL_DTYPE)  # (9*CP, S)
        g = jnp.dot(wc_ref[layer], stacked,
                    preferred_element_type=jnp.float32)                 # (CP, S) f32
        h = jnp.maximum(g + b_ref[1 + layer], 0.0)

    # last_conv (1x1 -> 1 channel): f32 sublane reduction instead of an M=1 matmul.
    out = jnp.sum(h * wl_ref[...], axis=0, keepdims=True)               # (1, S)
    out = out + b_ref[NUM_LAYERS + 1][0:1, :]
    o_ref[0] = out.astype(o_ref.dtype)


def fold_and_pack_params(w1_oihw, b1, bn1_g, bn1_b, bn1_m, bn1_v,
                         wc_oihw, bc, bnc_g, bnc_b, bnc_m, bnc_v,
                         wl_oihw, bl):
    """Fold eval-mode BatchNorm into the convs and pack kernel-friendly layouts."""
    Cm, C = w1_oihw.shape[0], w1_oihw.shape[1]
    L = wc_oihw.shape[0]
    CP = max(8, ((Cm + 7) // 8) * 8)            # pad hidden channels to sublanes

    s1 = bn1_g * lax.rsqrt(bn1_v + EPS)                               # (Cm,)
    w1f = w1_oihw[:, :, 0, 0] * s1[:, None]                           # (Cm, C)
    b1f = (b1 - bn1_m) * s1 + bn1_b                                   # (Cm,)

    sc = bnc_g * lax.rsqrt(bnc_v + EPS)                               # (L, Cm)
    wcf = wc_oihw * sc[:, :, None, None, None]                        # (L,Cm,Cm,3,3)
    bcf = (bc - bnc_m) * sc + bnc_b                                   # (L, Cm)

    # Tap-stacked weights for the roll-the-input matmul:
    #   wcp[l, o, tap*CP + i] = wcf[l, o, i, ky, kx]  with tap = 3*ky + kx.
    wct = jnp.transpose(wcf, (0, 1, 3, 4, 2))                         # (L,Cm,3,3,Cm)
    wct = wct.reshape(L, Cm, 9, Cm)
    wct = jnp.pad(wct, ((0, 0), (0, CP - Cm), (0, 0), (0, CP - Cm)))  # (L,CP,9,CP)
    wcp = wct.reshape(L, CP, 9 * CP)

    w1p = jnp.pad(w1f, ((0, CP - Cm), (0, 0)))                        # (CP, C)
    wlp = jnp.pad(wl_oihw[0, :, 0, 0], (0, CP - Cm)).reshape(CP, 1)   # (CP, 1)

    b_rows = [jnp.pad(b1f, (0, CP - Cm))]
    for l in range(L):
        b_rows.append(jnp.pad(bcf[l], (0, CP - Cm)))
    b_rows.append(jnp.pad(bl, (0, CP - 1)))                           # last bias, row 0
    bp = jnp.stack(b_rows, axis=0).reshape(L + 2, CP, 1)              # (L+2, CP, 1)

    return {"w1": w1p.astype(MATMUL_DTYPE),
            "wc": wcp.astype(MATMUL_DTYPE),
            "wl": wlp.astype(jnp.float32),
            "b": bp.astype(jnp.float32)}


def _pick_batch_tile(N):
    # Amortize per-grid-step overhead, but keep >= 2 grid steps for v7x's 2 TCs.
    return max(1, min(MAX_BATCH_TILE, N // 2))


def spatial_attention(x_nchw, params):
    """NCHW in / NCHW out, matching the PyTorch module's forward()."""
    N, C, H, W = x_nchw.shape
    HW = H * W
    w1p, wcp, wlp, bp = params["w1"], params["wc"], params["wl"], params["b"]
    CP = w1p.shape[0]

    b_tile = _pick_batch_tile(N)
    NB = pl.cdiv(N, b_tile)
    Npad = NB * b_tile
    S = b_tile * HW

    # Fold B_TILE batch elements onto the lane axis: (NB, C, B_TILE*HW).
    x = x_nchw.reshape(N, C, HW)
    if Npad != N:
        x = jnp.pad(x, ((0, Npad - N), (0, 0), (0, 0)))
    x = x.reshape(NB, b_tile, C, HW)
    x = jnp.transpose(x, (0, 2, 1, 3)).reshape(NB, C, S)
    x = x.astype(MATMUL_DTYPE)

    # Per-tap border masks for zero padding (output frame), tiled across the
    # batch tile (also isolates batch chunks from cross-boundary rolls) and
    # pre-broadcast over the CP hidden rows.
    hw = jnp.arange(HW, dtype=jnp.int32)
    yy, xx = hw // W, hw % W
    mask_rows = []
    for ky in range(3):
        for kx in range(3):
            oy, ox = (ky - 1) * DIA, (kx - 1) * DIA
            valid = ((yy + oy >= 0) & (yy + oy < H) &
                     (xx + ox >= 0) & (xx + ox < W))
            mask_rows.append(valid.astype(jnp.float32))
    masks = jnp.stack(mask_rows, axis=0)                              # (9, HW)
    masks = jnp.tile(masks, (1, b_tile))                              # (9, S)
    mask9 = jnp.broadcast_to(masks[:, None, :], (9, CP, S)).reshape(9 * CP, S)

    kernel = functools.partial(_spatial_attention_kernel,
                               H=H, W=W, CP=CP, B_TILE=b_tile)

    flops = 2 * Npad * HW * (C * CP + NUM_LAYERS * 9 * CP * CP + CP)
    bytes_accessed = (Npad * C * HW * x.dtype.itemsize        # x stream (bf16)
                      + Npad * HW * 4                         # 1-channel output
                      + mask9.size * 4
                      + w1p.size * 2 + wcp.size * 2 + wlp.size * 4 + bp.size * 4)
    cost = pl.CostEstimate(flops=flops, transcendentals=0,
                           bytes_accessed=bytes_accessed)

    att = pl.pallas_call(
        kernel,
        out_shape=jax.ShapeDtypeStruct((NB, 1, S), jnp.float32),
        grid_spec=pltpu.PrefetchScalarGridSpec(
            num_scalar_prefetch=0,
            grid=(NB,),
            in_specs=[
                pl.BlockSpec((1, C, S), lambda n: (n, 0, 0)),
                pl.BlockSpec(mask9.shape, lambda n: (0, 0)),
                pl.BlockSpec(w1p.shape, lambda n: (0, 0)),
                pl.BlockSpec(wcp.shape, lambda n: (0, 0, 0)),
                pl.BlockSpec(wlp.shape, lambda n: (0, 0)),
                pl.BlockSpec(bp.shape, lambda n: (0, 0, 0)),
            ],
            out_specs=pl.BlockSpec((1, 1, S), lambda n: (n, 0, 0)),
            scratch_shapes=[pltpu.VMEM((9 * CP, S), jnp.float32)],
        ),
        compiler_params=pltpu.CompilerParams(
            dimension_semantics=("parallel",)),
        cost_estimate=cost,
    )(x, mask9, w1p, wcp, wlp, bp)

    # Un-fold the batch tile (1-channel output: pure reshape, no transpose),
    # then expand_as(x): broadcast over C in the wrapper (XLA fuses this).
    att = att.reshape(Npad, HW)[:N].reshape(N, 1, H, W)
    return jnp.broadcast_to(att, (N, C, H, W))


if __name__ == "__main__":
    # Small shapes consistent with SpatialAttention(channel=64, reduction=16).
    N, C, H, W = 2, 64, 16, 16
    reduction = 16
    Cm = C // reduction                                # 4 hidden channels

    key = jax.random.PRNGKey(0)
    ks = jax.random.split(key, 16)

    # PyTorch-shaped (OIHW) parameters, deterministic init.
    w1_oihw = 0.1 * jax.random.normal(ks[0], (Cm, C, 1, 1), jnp.float32)
    b1v     = 0.1 * jax.random.normal(ks[1], (Cm,), jnp.float32)
    bn1_g   = 1.0 + 0.1 * jax.random.normal(ks[2], (Cm,), jnp.float32)
    bn1_b   = 0.1 * jax.random.normal(ks[3], (Cm,), jnp.float32)
    bn1_m   = 0.1 * jax.random.normal(ks[4], (Cm,), jnp.float32)
    bn1_v   = 0.5 + jax.random.uniform(ks[5], (Cm,), jnp.float32)

    wc_oihw = 0.1 * jax.random.normal(ks[6], (NUM_LAYERS, Cm, Cm, 3, 3), jnp.float32)
    bcv     = 0.1 * jax.random.normal(ks[7], (NUM_LAYERS, Cm), jnp.float32)
    bnc_g   = 1.0 + 0.1 * jax.random.normal(ks[8], (NUM_LAYERS, Cm), jnp.float32)
    bnc_b   = 0.1 * jax.random.normal(ks[9], (NUM_LAYERS, Cm), jnp.float32)
    bnc_m   = 0.1 * jax.random.normal(ks[10], (NUM_LAYERS, Cm), jnp.float32)
    bnc_v   = 0.5 + jax.random.uniform(ks[11], (NUM_LAYERS, Cm), jnp.float32)

    wl_oihw = 0.1 * jax.random.normal(ks[12], (1, Cm, 1, 1), jnp.float32)
    blv     = 0.1 * jax.random.normal(ks[13], (1,), jnp.float32)

    x = jax.random.normal(ks[14], (N, C, H, W), jnp.float32)

    params = fold_and_pack_params(w1_oihw, b1v, bn1_g, bn1_b, bn1_m, bn1_v,
                                  wc_oihw, bcv, bnc_g, bnc_b, bnc_m, bnc_v,
                                  wl_oihw, blv)

    out = spatial_attention(x, params)
    out = jax.block_until_ready(out)

    # Pure-JAX reference (eval-mode BN, un-folded parameters, f32 HIGHEST).
    def ref_forward(x):
        dn = ('NCHW', 'OIHW', 'NCHW')
        prec = lax.Precision.HIGHEST

        def bn(y, g, b, m, v):
            return (y - m[None, :, None, None]) * lax.rsqrt(v + EPS)[None, :, None, None] \
                   * g[None, :, None, None] + b[None, :, None, None]

        h = lax.conv_general_dilated(x, w1_oihw, (1, 1), 'VALID',
                                     dimension_numbers=dn, precision=prec) \
            + b1v[None, :, None, None]
        h = jnp.maximum(bn(h, bn1_g, bn1_b, bn1_m, bn1_v), 0.0)
        for i in range(NUM_LAYERS):
            h = lax.conv_general_dilated(h, wc_oihw[i], (1, 1),
                                         [(DIA, DIA), (DIA, DIA)],
                                         rhs_dilation=(DIA, DIA),
                                         dimension_numbers=dn, precision=prec) \
                + bcv[i][None, :, None, None]
            h = jnp.maximum(bn(h, bnc_g[i], bnc_b[i], bnc_m[i], bnc_v[i]), 0.0)
        o = lax.conv_general_dilated(h, wl_oihw, (1, 1), 'VALID',
                                     dimension_numbers=dn, precision=prec) \
            + blv[None, :, None, None]
        return jnp.broadcast_to(o, x.shape)

    ref = jax.block_until_ready(ref_forward(x))
    max_err = float(jnp.max(jnp.abs(out - ref)))
    # bf16 MXU operands loosen the match vs the f32 HIGHEST reference.
    tol = 5e-2 if MATMUL_DTYPE == jnp.bfloat16 else 1e-3
    assert max_err < tol, f"mismatch vs reference: max abs err = {max_err}"

    print("KERNEL_OK")
</pallas_src>

<mosaic_0001>
module attributes {stable_mosaic.version = 11 : i64} {
  func.func @_spatial_attention_kernel(%arg0: i32, %arg1: memref<1x64x256xbf16, #tpu.memory_space<vmem>>, %arg2: memref<72x256xf32, #tpu.memory_space<vmem>>, %arg3: memref<8x64xbf16, #tpu.memory_space<vmem>>, %arg4: memref<3x8x72xbf16, #tpu.memory_space<vmem>>, %arg5: memref<8x1xf32, #tpu.memory_space<vmem>>, %arg6: memref<5x8x1xf32, #tpu.memory_space<vmem>>, %arg7: memref<1x1x256xf32, #tpu.memory_space<vmem>>, %arg8: memref<72x256xf32, #tpu.memory_space<vmem>>) attributes {dimension_semantics = [#tpu.dimension_semantics<parallel>], iteration_bounds = array<i64: 2>, scalar_prefetch = 0 : i64, scratch_operands = 1 : i64, tpu.core_type = #tpu.core_type<tc>, window_params = [{transform_indices = @transform_0, window_bounds = array<i64: 1, 64, 256>}, {pipeline_mode = #tpu.pipeline_mode<synchronous>, transform_indices = @transform_1, window_bounds = array<i64: 72, 256>}, {pipeline_mode = #tpu.pipeline_mode<synchronous>, transform_indices = @transform_2, window_bounds = array<i64: 8, 64>}, {pipeline_mode = #tpu.pipeline_mode<synchronous>, transform_indices = @transform_3, window_bounds = array<i64: 3, 8, 72>}, {pipeline_mode = #tpu.pipeline_mode<synchronous>, transform_indices = @transform_4, window_bounds = array<i64: 8, 1>}, {pipeline_mode = #tpu.pipeline_mode<synchronous>, transform_indices = @transform_5, window_bounds = array<i64: 5, 8, 1>}, {transform_indices = @transform_6, window_bounds = array<i64: 1, 1, 256>}]} {
    %c0 = arith.constant 0 : index
    %c0_0 = arith.constant 0 : index
    %c0_1 = arith.constant 0 : index
    %0 = vector.load %arg1[%c0, %c0_0, %c0_1] : memref<1x64x256xbf16, #tpu.memory_space<vmem>>, vector<1x64x256xbf16>
    %1 = vector.shape_cast %0 : vector<1x64x256xbf16> to vector<64x256xbf16>
    %c0_2 = arith.constant 0 : index
    %c0_3 = arith.constant 0 : index
    %2 = vector.load %arg3[%c0_2, %c0_3] : memref<8x64xbf16, #tpu.memory_space<vmem>>, vector<8x64xbf16>
    %cst = arith.constant dense<0.000000e+00> : vector<8x256xf32>
    %3 = tpu.matmul %2, %1, %cst {dimension_numbers = #tpu.dot_dimension_numbers<[1], [0], [0], [1], [0, 0, 1, 1], [], []>} : vector<8x64xbf16>, vector<64x256xbf16>, vector<8x256xf32> -> vector<8x256xf32>
    %c0_4 = arith.constant 0 : index
    %c0_5 = arith.constant 0 : index
    %c0_6 = arith.constant 0 : index
    %4 = vector.load %arg6[%c0_4, %c0_5, %c0_6] : memref<5x8x1xf32, #tpu.memory_space<vmem>>, vector<1x8x1xf32>
    %5 = vector.shape_cast %4 : vector<1x8x1xf32> to vector<8x1xf32>
    %6 = vector.broadcast %5 : vector<8x1xf32> to vector<8x256xf32>
    %7 = arith.addf %3, %6 : vector<8x256xf32>
    %cst_7 = arith.constant 0.000000e+00 : f32
    %8 = vector.broadcast %cst_7 : f32 to vector<8x256xf32>
    %9 = arith.maximumf %7, %8 : vector<8x256xf32>
    %c34_i32 = arith.constant 34 : i32
    %10 = tpu.dynamic_rotate %9 by %c34_i32 dim 1 : vector<8x256xf32>, i32 -> vector<8x256xf32>
    %c0_8 = arith.constant 0 : index
    %c0_9 = arith.constant 0 : index
    %11 = vector.load %arg8[%c0_8, %c0_9] : memref<72x256xf32, #tpu.memory_space<vmem>>, vector<8x256xf32>
    tpu.vector_store %arg8[%c0_8, %c0_9], %10 {strides = array<i32>} : memref<72x256xf32, #tpu.memory_space<vmem>>, vector<8x256xf32>,
    %c32_i32 = arith.constant 32 : i32
    %12 = tpu.dynamic_rotate %9 by %c32_i32 dim 1 : vector<8x256xf32>, i32 -> vector<8x256xf32>
    %c8 = arith.constant 8 : index
    %c0_10 = arith.constant 0 : index
    %13 = vector.load %arg8[%c8, %c0_10] : memref<72x256xf32, #tpu.memory_space<vmem>>, vector<8x256xf32>
    tpu.vector_store %arg8[%c8, %c0_10], %12 {strides = array<i32>} : memref<72x256xf32, #tpu.memory_space<vmem>>, vector<8x256xf32>,
    %c30_i32 = arith.constant 30 : i32
    %14 = tpu.dynamic_rotate %9 by %c30_i32 dim 1 : vector<8x256xf32>, i32 -> vector<8x256xf32>
    %c16 = arith.constant 16 : index
    %c0_11 = arith.constant 0 : index
    %15 = vector.load %arg8[%c16, %c0_11] : memref<72x256xf32, #tpu.memory_space<vmem>>, vector<8x256xf32>
    tpu.vector_store %arg8[%c16, %c0_11], %14 {strides = array<i32>} : memref<72x256xf32, #tpu.memory_space<vmem>>, vector<8x256xf32>,
    %c2_i32 = arith.constant 2 : i32
    %16 = tpu.dynamic_rotate %9 by %c2_i32 dim 1 : vector<8x256xf32>, i32 -> vector<8x256xf32>
    %c24 = arith.constant 24 : index
    %c0_12 = arith.constant 0 : index
    %17 = vector.load %arg8[%c24, %c0_12] : memref<72x256xf32, #tpu.memory_space<vmem>>, vector<8x256xf32>
    tpu.vector_store %arg8[%c24, %c0_12], %16 {strides = array<i32>} : memref<72x256xf32, #tpu.memory_space<vmem>>, vector<8x256xf32>,
    %c32 = arith.constant 32 : index
    %c0_13 = arith.constant 0 : index
    %18 = vector.load %arg8[%c32, %c0_13] : memref<72x256xf32, #tpu.memory_space<vmem>>, vector<8x256xf32>
    tpu.vector_store %arg8[%c32, %c0_13], %9 {strides = array<i32>} : memref<72x256xf32, #tpu.memory_space<vmem>>, vector<8x256xf32>,
    %c254_i32 = arith.constant 254 : i32
    %19 = tpu.dynamic_rotate %9 by %c254_i32 dim 1 : vector<8x256xf32>, i32 -> vector<8x256xf32>
    %c40 = arith.constant 40 : index
    %c0_14 = arith.constant 0 : index
    %20 = vector.load %arg8[%c40, %c0_14] : memref<72x256xf32, #tpu.memory_space<vmem>>, vector<8x256xf32>
    tpu.vector_store %arg8[%c40, %c0_14], %19 {strides = array<i32>} : memref<72x256xf32, #tpu.memory_space<vmem>>, vector<8x256xf32>,
    %c226_i32 = arith.constant 226 : i32
    %21 = tpu.dynamic_rotate %9 by %c226_i32 dim 1 : vector<8x256xf32>, i32 -> vector<8x256xf32>
    %c48 = arith.constant 48 : index
    %c0_15 = arith.constant 0 : index
    %22 = vector.load %arg8[%c48, %c0_15] : memref<72x256xf32, #tpu.memory_space<vmem>>, vector<8x256xf32>
    tpu.vector_store %arg8[%c48, %c0_15], %21 {strides = array<i32>} : memref<72x256xf32, #tpu.memory_space<vmem>>, vector<8x256xf32>,
    %c224_i32 = arith.constant 224 : i32
    %23 = tpu.dynamic_rotate %9 by %c224_i32 dim 1 : vector<8x256xf32>, i32 -> vector<8x256xf32>
    %c56 = arith.constant 56 : index
    %c0_16 = arith.constant 0 : index
    %24 = vector.load %arg8[%c56, %c0_16] : memref<72x256xf32, #tpu.memory_space<vmem>>, vector<8x256xf32>
    tpu.vector_store %arg8[%c56, %c0_16], %23 {strides = array<i32>} : memref<72x256xf32, #tpu.memory_space<vmem>>, vector<8x256xf32>,
    %c222_i32 = arith.constant 222 : i32
    %25 = tpu.dynamic_rotate %9 by %c222_i32 dim 1 : vector<8x256xf32>, i32 -> vector<8x256xf32>
    %c64 = arith.constant 64 : index
    %c0_17 = arith.constant 0 : index
    %26 = vector.load %arg8[%c64, %c0_17] : memref<72x256xf32, #tpu.memory_space<vmem>>, vector<8x256xf32>
    tpu.vector_store %arg8[%c64, %c0_17], %25 {strides = array<i32>} : memref<72x256xf32, #tpu.memory_space<vmem>>, vector<8x256xf32>,
    %c0_18 = arith.constant 0 : index
    %c0_19 = arith.constant 0 : index
    %27 = vector.load %arg8[%c0_18, %c0_19] : memref<72x256xf32, #tpu.memory_space<vmem>>, vector<72x256xf32>
    %c0_20 = arith.constant 0 : index
    %c0_21 = arith.constant 0 : index
    %28 = vector.load %arg2[%c0_20, %c0_21] : memref<72x256xf32, #tpu.memory_space<vmem>>, vector<72x256xf32>
    %29 = arith.mulf %27, %28 : vector<72x256xf32>
    %30 = arith.truncf %29 : vector<72x256xf32> to vector<72x256xbf16>
    %c0_22 = arith.constant 0 : index
    %c0_23 = arith.constant 0 : index
    %c0_24 = arith.constant 0 : index
    %31 = vector.load %arg4[%c0_22, %c0_23, %c0_24] : memref<3x8x72xbf16, #tpu.memory_space<vmem>>, vector<1x8x72xbf16>
    %32 = vector.shape_cast %31 : vector<1x8x72xbf16> to vector<8x72xbf16>
    %cst_25 = arith.constant dense<0.000000e+00> : vector<8x256xf32>
    %33 = tpu.matmul %32, %30, %cst_25 {dimension_numbers = #tpu.dot_dimension_numbers<[1], [0], [0], [1], [0, 0, 1, 1], [], []>} : vector<8x72xbf16>, vector<72x256xbf16>, vector<8x256xf32> -> vector<8x256xf32>
    %c1 = arith.constant 1 : index
    %c0_26 = arith.constant 0 : index
    %c0_27 = arith.constant 0 : index
    %34 = vector.load %arg6[%c1, %c0_26, %c0_27] : memref<5x8x1xf32, #tpu.memory_space<vmem>>, vector<1x8x1xf32>
    %35 = vector.shape_cast %34 : vector<1x8x1xf32> to vector<8x1xf32>
    %36 = vector.broadcast %35 : vector<8x1xf32> to vector<8x256xf32>
    %37 = arith.addf %33, %36 : vector<8x256xf32>
    %cst_28 = arith.constant 0.000000e+00 : f32
    %38 = vector.broadcast %cst_28 : f32 to vector<8x256xf32>
    %39 = arith.maximumf %37, %38 : vector<8x256xf32>
    %c34_i32_29 = arith.constant 34 : i32
    %40 = tpu.dynamic_rotate %39 by %c34_i32_29 dim 1 : vector<8x256xf32>, i32 -> vector<8x256xf32>
    %c0_30 = arith.constant 0 : index
    %c0_31 = arith.constant 0 : index
    %41 = vector.load %arg8[%c0_30, %c0_31] : memref<72x256xf32, #tpu.memory_space<vmem>>, vector<8x256xf32>
    tpu.vector_store %arg8[%c0_30, %c0_31], %40 {strides = array<i32>} : memref<72x256xf32, #tpu.memory_space<vmem>>, vector<8x256xf32>,
    %c32_i32_32 = arith.constant 32 : i32
    %42 = tpu.dynamic_rotate %39 by %c32_i32_32 dim 1 : vector<8x256xf32>, i32 -> vector<8x256xf32>
    %c8_33 = arith.constant 8 : index
    %c0_34 = arith.constant 0 : index
    %43 = vector.load %arg8[%c8_33, %c0_34] : memref<72x256xf32, #tpu.memory_space<vmem>>, vector<8x256xf32>
    tpu.vector_store %arg8[%c8_33, %c0_34], %42 {strides = array<i32>} : memref<72x256xf32, #tpu.memory_space<vmem>>, vector<8x256xf32>,
    %c30_i32_35 = arith.constant 30 : i32
    %44 = tpu.dynamic_rotate %39 by %c30_i32_35 dim 1 : vector<8x256xf32>, i32 -> vector<8x256xf32>
    %c16_36 = arith.constant 16 : index
    %c0_37 = arith.constant 0 : index
    %45 = vector.load %arg8[%c16_36, %c0_37] : memref<72x256xf32, #tpu.memory_space<vmem>>, vector<8x256xf32>
    tpu.vector_store %arg8[%c16_36, %c0_37], %44 {strides = array<i32>} : memref<72x256xf32, #tpu.memory_space<vmem>>, vector<8x256xf32>,
    %c2_i32_38 = arith.constant 2 : i32
    %46 = tpu.dynamic_rotate %39 by %c2_i32_38 dim 1 : vector<8x256xf32>, i32 -> vector<8x256xf32>
    %c24_39 = arith.constant 24 : index
    %c0_40 = arith.constant 0 : index
    %47 = vector.load %arg8[%c24_39, %c0_40] : memref<72x256xf32, #tpu.memory_space<vmem>>, vector<8x256xf32>
    tpu.vector_store %arg8[%c24_39, %c0_40], %46 {strides = array<i32>} : memref<72x256xf32, #tpu.memory_space<vmem>>, vector<8x256xf32>,
    %c32_41 = arith.constant 32 : index
    %c0_42 = arith.constant 0 : index
    %48 = vector.load %arg8[%c32_41, %c0_42] : memref<72x256xf32, #tpu.memory_space<vmem>>, vector<8x256xf32>
    tpu.vector_store %arg8[%c32_41, %c0_42], %39 {strides = array<i32>} : memref<72x256xf32, #tpu.memory_space<vmem>>, vector<8x256xf32>,
    %c254_i32_43 = arith.constant 254 : i32
    %49 = tpu.dynamic_rotate %39 by %c254_i32_43 dim 1 : vector<8x256xf32>, i32 -> vector<8x256xf32>
    %c40_44 = arith.constant 40 : index
    %c0_45 = arith.constant 0 : index
    %50 = vector.load %arg8[%c40_44, %c0_45] : memref<72x256xf32, #tpu.memory_space<vmem>>, vector<8x256xf32>
    tpu.vector_store %arg8[%c40_44, %c0_45], %49 {strides = array<i32>} : memref<72x256xf32, #tpu.memory_space<vmem>>, vector<8x256xf32>,
    %c226_i32_46 = arith.constant 226 : i32
    %51 = tpu.dynamic_rotate %39 by %c226_i32_46 dim 1 : vector<8x256xf32>, i32 -> vector<8x256xf32>
    %c48_47 = arith.constant 48 : index
    %c0_48 = arith.constant 0 : index
    %52 = vector.load %arg8[%c48_47, %c0_48] : memref<72x256xf32, #tpu.memory_space<vmem>>, vector<8x256xf32>
    tpu.vector_store %arg8[%c48_47, %c0_48], %51 {strides = array<i32>} : memref<72x256xf32, #tpu.memory_space<vmem>>, vector<8x256xf32>,
    %c224_i32_49 = arith.constant 224 : i32
    %53 = tpu.dynamic_rotate %39 by %c224_i32_49 dim 1 : vector<8x256xf32>, i32 -> vector<8x256xf32>
    %c56_50 = arith.constant 56 : index
    %c0_51 = arith.constant 0 : index
    %54 = vector.load %arg8[%c56_50, %c0_51] : memref<72x256xf32, #tpu.memory_space<vmem>>, vector<8x256xf32>
    tpu.vector_store %arg8[%c56_50, %c0_51], %53 {strides = array<i32>} : memref<72x256xf32, #tpu.memory_space<vmem>>, vector<8x256xf32>,
    %c222_i32_52 = arith.constant 222 : i32
    %55 = tpu.dynamic_rotate %39 by %c222_i32_52 dim 1 : vector<8x256xf32>, i32 -> vector<8x256xf32>
    %c64_53 = arith.constant 64 : index
    %c0_54 = arith.constant 0 : index
    %56 = vector.load %arg8[%c64_53, %c0_54] : memref<72x256xf32, #tpu.memory_space<vmem>>, vector<8x256xf32>
    tpu.vector_store %arg8[%c64_53, %c0_54], %55 {strides = array<i32>} : memref<72x256xf32, #tpu.memory_space<vmem>>, vector<8x256xf32>,
    %c0_55 = arith.constant 0 : index
    %c0_56 = arith.constant 0 : index
    %57 = vector.load %arg8[%c0_55, %c0_56] : memref<72x256xf32, #tpu.memory_space<vmem>>, vector<72x256xf32>
    %c0_57 = arith.constant 0 : index
    %c0_58 = arith.constant 0 : index
    %58 = vector.load %arg2[%c0_57, %c0_58] : memref<72x256xf32, #tpu.memory_space<vmem>>, vector<72x256xf32>
    %59 = arith.mulf %57, %58 : vector<72x256xf32>
    %60 = arith.truncf %59 : vector<72x256xf32> to vector<72x256xbf16>
    %c1_59 = arith.constant 1 : index
    %c0_60 = arith.constant 0 : index
    %c0_61 = arith.constant 0 : index
    %61 = vector.load %arg4[%c1_59, %c0_60, %c0_61] : memref<3x8x72xbf16, #tpu.memory_space<vmem>>, vector<1x8x72xbf16>
    %62 = vector.shape_cast %61 : vector<1x8x72xbf16> to vector<8x72xbf16>
    %cst_62 = arith.constant dense<0.000000e+00> : vector<8x256xf32>
    %63 = tpu.matmul %62, %60, %cst_62 {dimension_numbers = #tpu.dot_dimension_numbers<[1], [0], [0], [1], [0, 0, 1, 1], [], []>} : vector<8x72xbf16>, vector<72x256xbf16>, vector<8x256xf32> -> vector<8x256xf32>
    %c2 = arith.constant 2 : index
    %c0_63 = arith.constant 0 : index
    %c0_64 = arith.constant 0 : index
    %64 = vector.load %arg6[%c2, %c0_63, %c0_64] : memref<5x8x1xf32, #tpu.memory_space<vmem>>, vector<1x8x1xf32>
    %65 = vector.shape_cast %64 : vector<1x8x1xf32> to vector<8x1xf32>
    %66 = vector.broadcast %65 : vector<8x1xf32> to vector<8x256xf32>
    %67 = arith.addf %63, %66 : vector<8x256xf32>
    %cst_65 = arith.constant 0.000000e+00 : f32
    %68 = vector.broadcast %cst_65 : f32 to vector<8x256xf32>
    %69 = arith.maximumf %67, %68 : vector<8x256xf32>
    %c34_i32_66 = arith.constant 34 : i32
    %70 = tpu.dynamic_rotate %69 by %c34_i32_66 dim 1 : vector<8x256xf32>, i32 -> vector<8x256xf32>
    %c0_67 = arith.constant 0 : index
    %c0_68 = arith.constant 0 : index
    %71 = vector.load %arg8[%c0_67, %c0_68] : memref<72x256xf32, #tpu.memory_space<vmem>>, vector<8x256xf32>
    tpu.vector_store %arg8[%c0_67, %c0_68], %70 {strides = array<i32>} : memref<72x256xf32, #tpu.memory_space<vmem>>, vector<8x256xf32>,
    %c32_i32_69 = arith.constant 32 : i32
    %72 = tpu.dynamic_rotate %69 by %c32_i32_69 dim 1 : vector<8x256xf32>, i32 -> vector<8x256xf32>
    %c8_70 = arith.constant 8 : index
    %c0_71 = arith.constant 0 : index
    %73 = vector.load %arg8[%c8_70, %c0_71] : memref<72x256xf32, #tpu.memory_space<vmem>>, vector<8x256xf32>
    tpu.vector_store %arg8[%c8_70, %c0_71], %72 {strides = array<i32>} : memref<72x256xf32, #tpu.memory_space<vmem>>, vector<8x256xf32>,
    %c30_i32_72 = arith.constant 30 : i32
    %74 = tpu.dynamic_rotate %69 by %c30_i32_72 dim 1 : vector<8x256xf32>, i32 -> vector<8x256xf32>
    %c16_73 = arith.constant 16 : index
    %c0_74 = arith.constant 0 : index
    %75 = vector.load %arg8[%c16_73, %c0_74] : memref<72x256xf32, #tpu.memory_space<vmem>>, vector<8x256xf32>
    tpu.vector_store %arg8[%c16_73, %c0_74], %74 {strides = array<i32>} : memref<72x256xf32, #tpu.memory_space<vmem>>, vector<8x256xf32>,
    %c2_i32_75 = arith.constant 2 : i32
    %76 = tpu.dynamic_rotate %69 by %c2_i32_75 dim 1 : vector<8x256xf32>, i32 -> vector<8x256xf32>
    %c24_76 = arith.constant 24 : index
    %c0_77 = arith.constant 0 : index
    %77 = vector.load %arg8[%c24_76, %c0_77] : memref<72x256xf32, #tpu.memory_space<vmem>>, vector<8x256xf32>
    tpu.vector_store %arg8[%c24_76, %c0_77], %76 {strides = array<i32>} : memref<72x256xf32, #tpu.memory_space<vmem>>, vector<8x256xf32>,
    %c32_78 = arith.constant 32 : index
    %c0_79 = arith.constant 0 : index
    %78 = vector.load %arg8[%c32_78, %c0_79] : memref<72x256xf32, #tpu.memory_space<vmem>>, vector<8x256xf32>
    tpu.vector_store %arg8[%c32_78, %c0_79], %69 {strides = array<i32>} : memref<72x256xf32, #tpu.memory_space<vmem>>, vector<8x256xf32>,
    %c254_i32_80 = arith.constant 254 : i32
    %79 = tpu.dynamic_rotate %69 by %c254_i32_80 dim 1 : vector<8x256xf32>, i32 -> vector<8x256xf32>
    %c40_81 = arith.constant 40 : index
    %c0_82 = arith.constant 0 : index
    %80 = vector.load %arg8[%c40_81, %c0_82] : memref<72x256xf32, #tpu.memory_space<vmem>>, vector<8x256xf32>
    tpu.vector_store %arg8[%c40_81, %c0_82], %79 {strides = array<i32>} : memref<72x256xf32, #tpu.memory_space<vmem>>, vector<8x256xf32>,
    %c226_i32_83 = arith.constant 226 : i32
    %81 = tpu.dynamic_rotate %69 by %c226_i32_83 dim 1 : vector<8x256xf32>, i32 -> vector<8x256xf32>
    %c48_84 = arith.constant 48 : index
    %c0_85 = arith.constant 0 : index
    %82 = vector.load %arg8[%c48_84, %c0_85] : memref<72x256xf32, #tpu.memory_space<vmem>>, vector<8x256xf32>
    tpu.vector_store %arg8[%c48_84, %c0_85], %81 {strides = array<i32>} : memref<72x256xf32, #tpu.memory_space<vmem>>, vector<8x256xf32>,
    %c224_i32_86 = arith.constant 224 : i32
    %83 = tpu.dynamic_rotate %69 by %c224_i32_86 dim 1 : vector<8x256xf32>, i32 -> vector<8x256xf32>
    %c56_87 = arith.constant 56 : index
    %c0_88 = arith.constant 0 : index
    %84 = vector.load %arg8[%c56_87, %c0_88] : memref<72x256xf32, #tpu.memory_space<vmem>>, vector<8x256xf32>
    tpu.vector_store %arg8[%c56_87, %c0_88], %83 {strides = array<i32>} : memref<72x256xf32, #tpu.memory_space<vmem>>, vector<8x256xf32>,
    %c222_i32_89 = arith.constant 222 : i32
    %85 = tpu.dynamic_rotate %69 by %c222_i32_89 dim 1 : vector<8x256xf32>, i32 -> vector<8x256xf32>
    %c64_90 = arith.constant 64 : index
    %c0_91 = arith.constant 0 : index
    %86 = vector.load %arg8[%c64_90, %c0_91] : memref<72x256xf32, #tpu.memory_space<vmem>>, vector<8x256xf32>
    tpu.vector_store %arg8[%c64_90, %c0_91], %85 {strides = array<i32>} : memref<72x256xf32, #tpu.memory_space<vmem>>, vector<8x256xf32>,
    %c0_92 = arith.constant 0 : index
    %c0_93 = arith.constant 0 : index
    %87 = vector.load %arg8[%c0_92, %c0_93] : memref<72x256xf32, #tpu.memory_space<vmem>>, vector<72x256xf32>
    %c0_94 = arith.constant 0 : index
    %c0_95 = arith.constant 0 : index
    %88 = vector.load %arg2[%c0_94, %c0_95] : memref<72x256xf32, #tpu.memory_space<vmem>>, vector<72x256xf32>
    %89 = arith.mulf %87, %88 : vector<72x256xf32>
    %90 = arith.truncf %89 : vector<72x256xf32> to vector<72x256xbf16>
    %c2_96 = arith.constant 2 : index
    %c0_97 = arith.constant 0 : index
    %c0_98 = arith.constant 0 : index
    %91 = vector.load %arg4[%c2_96, %c0_97, %c0_98] : memref<3x8x72xbf16, #tpu.memory_space<vmem>>, vector<1x8x72xbf16>
    %92 = vector.shape_cast %91 : vector<1x8x72xbf16> to vector<8x72xbf16>
    %cst_99 = arith.constant dense<0.000000e+00> : vector<8x256xf32>
    %93 = tpu.matmul %92, %90, %cst_99 {dimension_numbers = #tpu.dot_dimension_numbers<[1], [0], [0], [1], [0, 0, 1, 1], [], []>} : vector<8x72xbf16>, vector<72x256xbf16>, vector<8x256xf32> -> vector<8x256xf32>
    %c3 = arith.constant 3 : index
    %c0_100 = arith.constant 0 : index
    %c0_101 = arith.constant 0 : index
    %94 = vector.load %arg6[%c3, %c0_100, %c0_101] : memref<5x8x1xf32, #tpu.memory_space<vmem>>, vector<1x8x1xf32>
    %95 = vector.shape_cast %94 : vector<1x8x1xf32> to vector<8x1xf32>
    %96 = vector.broadcast %95 : vector<8x1xf32> to vector<8x256xf32>
    %97 = arith.addf %93, %96 : vector<8x256xf32>
    %cst_102 = arith.constant 0.000000e+00 : f32
    %98 = vector.broadcast %cst_102 : f32 to vector<8x256xf32>
    %99 = arith.maximumf %97, %98 : vector<8x256xf32>
    %c0_103 = arith.constant 0 : index
    %c0_104 = arith.constant 0 : index
    %100 = vector.load %arg5[%c0_103, %c0_104] : memref<8x1xf32, #tpu.memory_space<vmem>>, vector<8x1xf32>
    %101 = vector.broadcast %100 : vector<8x1xf32> to vector<8x256xf32>
    %102 = arith.mulf %99, %101 : vector<8x256xf32>
    %cst_105 = arith.constant dense<0.000000e+00> : vector<256xf32>
    %103 = vector.multi_reduction <add>, %102, %cst_105 [0] : vector<8x256xf32> to vector<256xf32>
    %104 = vector.shape_cast %103 : vector<256xf32> to vector<1x256xf32>
    %c4 = arith.constant 4 : index
    %c0_106 = arith.constant 0 : index
    %c0_107 = arith.constant 0 : index
    %105 = vector.load %arg6[%c4, %c0_106, %c0_107] : memref<5x8x1xf32, #tpu.memory_space<vmem>>, vector<1x8x1xf32>
    %106 = vector.shape_cast %105 : vector<1x8x1xf32> to vector<8x1xf32>
    %107 = vector.extract_strided_slice %106 {offsets = [0, 0], sizes = [1, 1], strides = [1, 1]} : vector<8x1xf32> to vector<1x1xf32>
    %108 = vector.broadcast %107 : vector<1x1xf32> to vector<1x256xf32>
    %109 = arith.addf %104, %108 : vector<1x256xf32>
    %c0_108 = arith.constant 0 : index
    %c0_109 = arith.constant 0 : index
    %c0_110 = arith.constant 0 : index
    %110 = vector.load %arg7[%c0_108, %c0_109, %c0_110] : memref<1x1x256xf32, #tpu.memory_space<vmem>>, vector<1x1x256xf32>
    %111 = vector.shape_cast %110 : vector<1x1x256xf32> to vector<1x256xf32>
    %112 = vector.shape_cast %109 : vector<1x256xf32> to vector<1x1x256xf32>
    tpu.vector_store %arg7[%c0_108, %c0_109, %c0_110], %112 {strides = array<i32>} : memref<1x1x256xf32, #tpu.memory_space<vmem>>, vector<1x1x256xf32>,
    return
  }
  func.func @transform_0(%arg0: i32) -> (i32, i32, i32) {
    %c0_i32 = arith.constant 0 : i32
    %c0_i32_0 = arith.constant 0 : i32
    %c0_i32_1 = arith.constant 0 : i32
    return %arg0, %c0_i32, %c0_i32_0 : i32, i32, i32
  }
  func.func @transform_1(%arg0: i32) -> (i32, i32) {
    %c0_i32 = arith.constant 0 : i32
    %c0_i32_0 = arith.constant 0 : i32
    %c0_i32_1 = arith.constant 0 : i32
    return %c0_i32, %c0_i32_0 : i32, i32
  }
  func.func @transform_2(%arg0: i32) -> (i32, i32) {
    %c0_i32 = arith.constant 0 : i32
    %c0_i32_0 = arith.constant 0 : i32
    %c0_i32_1 = arith.constant 0 : i32
    return %c0_i32, %c0_i32_0 : i32, i32
  }
  func.func @transform_3(%arg0: i32) -> (i32, i32, i32) {
    %c0_i32 = arith.constant 0 : i32
    %c0_i32_0 = arith.constant 0 : i32
    %c0_i32_1 = arith.constant 0 : i32
    %c0_i32_2 = arith.constant 0 : i32
    return %c0_i32, %c0_i32_0, %c0_i32_1 : i32, i32, i32
  }
  func.func @transform_4(%arg0: i32) -> (i32, i32) {
    %c0_i32 = arith.constant 0 : i32
    %c0_i32_0 = arith.constant 0 : i32
    %c0_i32_1 = arith.constant 0 : i32
    return %c0_i32, %c0_i32_0 : i32, i32
  }
  func.func @transform_5(%arg0: i32) -> (i32, i32, i32) {
    %c0_i32 = arith.constant 0 : i32
    %c0_i32_0 = arith.constant 0 : i32
    %c0_i32_1 = arith.constant 0 : i32
    %c0_i32_2 = arith.constant 0 : i32
    return %c0_i32, %c0_i32_0, %c0_i32_1 : i32, i32, i32
  }
  func.func @transform_6(%arg0: i32) -> (i32, i32, i32) {
    %c0_i32 = arith.constant 0 : i32
    %c0_i32_0 = arith.constant 0 : i32
    %c0_i32_1 = arith.constant 0 : i32
    return %arg0, %c0_i32, %c0_i32_0 : i32, i32, i32
  }
}

</mosaic_0001>

<bundles_post_ra>
// kernel: tpu_custom_call.1
= control target key start
LH: loop header
LB: loop body
LE: loop exit
PB: predicated region body
PF: predicated region fallthrough
CT: control target
= control target key end

     0   :  { %11 = vsyncpa [#allocation4], 0  ;;  %s1897_s0 = inlined_call_operand.hbm [shape: bf16[2,64,256], index: 0, kind: input, shape index: {}]   ;;  %s1898_s1 = inlined_call_operand.hbm [shape: f32[72,256], index: 1, kind: input, shape index: {}]   ;;  %s1899_s2 = inlined_call_operand.vmem [shape: bf16[8,64], index: 2, kind: input, shape index: {}]   ;;  %s1900_s3 = inlined_call_operand.vmem [shape: bf16[3,8,72], index: 3, kind: input, shape index: {}]   ;;  %s1901_s4 = inlined_call_operand.vmem [shape: f32[8,1], index: 4, kind: input, shape index: {}]   ;;  %s1902_s5 = inlined_call_operand.vmem [shape: f32[5,8,1], index: 5, kind: input, shape index: {}]   ;;  %s1903_s6 = inlined_call_operand.hbm [shape: f32[2,1,256], index: 6, kind: output, shape index: {}]  }
   0x1   :  { %13 = vsyncpa [#allocation4 + $0x1], 0 }
   0x2   :  { %14 = vsyncpa [#allocation7], 0 }
   0x3   :  { %15 = vsyncpa [#allocation5], 0 }
   0x4   :  { %17 = vsyncpa [#allocation5 + $0x1], 0  ;;  %s1419_s21 = smov 0   ;;  %s1421_s22 = smov 0  }
   0x5   :  { %s1423_s23 = smov 0   ;;  %s1425_s24 = smov 0  }
   0x6 LB: > { %s1440_s25 = sadd.s32 4294967295, %s1365_s24   ;;  %s1119_s26 = sadd.s32 4294967294, %s1365_s24   ;;  %s1365_s24 = sphi %s1425_s24, %s1925_s24   ;;  %s1361_s23 = sphi %s1423_s23, %s1924_s23   ;;  %s1357_s22 = sphi %s1421_s22, %s1923_s22   ;;  %s1353_s21 = sphi %s1419_s21, %s1922_s21  }
   0x7   : > { %p43_p0 = scmp.ne.s32.totalorder %s1357_s22, %s1353_s21  ;;  %p1904_p1 = scmp.eq.s32.totalorder %s1440_s25, 0 }
   0x8   : > { %p178_p3 = scmp.eq.s32.totalorder %s1119_s26, 1  ;;  %p1120_p5 = scmp.ge.s32.totalorder %s1365_s24, 1 }
   0x9   : > { %p1449_p4 = por %p1904_p1, %p43_p0  ;;  %p185_p7 = scmp.lt.s32.totalorder %s1365_s24, 3 }
   0xa   : > { %p1454_p6 = por %p178_p3, %p43_p0  ;;  %s1367_s30 = smov [#allocation6]  }
   0xb   : > { %s1908_s27 = scalar_select %p1449_p4, 1, 0 }
   0xc   : > { %s1909_s28 = scalar_select %p1454_p6, 1, 0 }
   0xd   : > { %p1459_p8 = pnand %p1120_p5, %p185_p7  ;;  %s197_s7 = sshll.u32 %s1367_s30, 4  ;;  %s198_s7 = int_to_ptr.vmem [resolvable:$true] %s197_s7 }
   0xe   : > { %s1473_s9 = sadd.s32 1, %s1365_s24   ;;  %s30_s10 = sadd.s32 1, %s1361_s23 }
   0xf   : > { %s1910_s29 = scalar_select %p1459_p8, 1, 0 }
  0x10   : > { %p1166_p9 = pneg %p1459_p8  ;;  %s27_s11 = ssub.s32 %s1365_s24, %s1473_s9 }
  0x11   : > { %s1254_s12 = scalar_lea.vmem %s198_s7, 2304  ;;  %p1262_p5 = scmp.lt.s32.totalorder %s198_s7, %s198_s7 }
  0x12   : > { %p1468_p11 = pnand %p1166_p9, %p1904_p1  ;;  %p1255_p13 = scmp.ne.s32.totalorder %s198_s7, %s1254_s12 }
  0x13   : > { %p1263_p7 = scmp.lt.s32.totalorder %s1254_s12, %s1254_s12 }
  0x14   : > { %p1245_p12 = pneg %p1468_p11 }
  0x15   : > { %p1264_p10 = por %p1263_p7, %p1262_p5 }
  0x16   : > { %p1257_p0 = pnand %p1255_p13, %p1245_p12 }
  0x18   : > { %p1258_p3 = pneg %p1257_p0 }
  0x1a   : > { %p1265_p2 = pnand %p1264_p10, %p1258_p3 }
  0x1c   : > { %1268 = shalt.err (!%p1265_p2)
}
  0x1d   : > { %s1368_s13 = smov 256   ;;  %s1369_s14 = smov 16  }
  0x1e   : > { %1169 = dma.hbm_to_vmem [thread:$0]  (!%p1468_p11), %s1898_s1, 2304, %s198_s7, [#allocation7], %s1368_s13, %s1368_s13, %s1369_s14  }
  0x1f   : > { %p28_p9 = scmp.eq.s32.totalorder %s27_s11, 0  ;;  %p37_p12 = scmp.ne.s32.totalorder %s1361_s23, %s1357_s22 }
  0x20   : > { %p38_p10 = scmp.eq.s32.totalorder %s1365_s24, 0  ;;  %p1179_p2 = scmp.lt.s32.totalorder %s1365_s24, 2 }
  0x21   : > { %s1490_s17 = scalar_select %p28_p9, %s1361_s23, %s30_s10  }
  0x22   : > { %p39_p13 = por %p38_p10, %p37_p12  ;;  %p1912_p0 = scmp.eq.s32.totalorder %s1440_s25, 1 }
  0x23   : > { %s223_s19 = sand.u32 1, %s1361_s23   ;;  %s1156_s20 = sshll.u32 %s1365_s24, 10 }
  0x24   : > { %p1494_p3 = por %p1912_p0, %p37_p12  ;;  %s1123_s26 = sshll.u32 %s223_s19, 6 }
  0x25   : > { %s1503_s12 = scalar_lea.hbm %s1897_s0, %s1156_s20  ;;  %s227_s7 = scalar_lea.vmem [#allocation3], %s1123_s26 }
  0x26   : > { %s1913_s18 = scalar_select %p1494_p3, 1, 0 }
  0x27   : > { %s234_s10 = sshll.u32 %s227_s7, 4  ;;  %p1505_p11 = pnand %p1179_p2, %p39_p13  ;;  %s1509_s10 = int_to_ptr.vmem [resolvable:$true] %s234_s10 }
  0x28   : > { %s1511_s13 = scalar_lea.sflag [#allocation4], %s223_s19  ;;  %s1269_s14 = scalar_lea.hbm %s1503_s12, 1024 }
  0x29   : > { %p1270_p5 = scmp.ne.s32.totalorder %s1503_s12, %s1269_s14  ;;  %p1271_p7 = pneg %p1505_p11 }
  0x2a   : > { %s1274_s20 = scalar_lea.hbm %s1897_s0, 2048  ;;  %p1275_p10 = scmp.lt.s32.totalorder %s1503_s12, %s1897_s0 }
  0x2b   : > { %p1272_p9 = pnand %p1271_p7, %p1270_p5  ;;  %p1276_p2 = scmp.lt.s32.totalorder %s1274_s20, %s1269_s14 }
  0x2d   : > { %p1273_p12 = pneg %p1272_p9  ;;  %p1277_p13 = por %p1276_p2, %p1275_p10 }
  0x2f   : > { %p1278_p0 = pnand %p1277_p13, %p1273_p12 }
  0x31   : > { %1281 = shalt.err (!%p1278_p0)
}
  0x32   : > { %s1282_s19 = scalar_lea.vmem %s1509_s10, 1024  ;;  %s1370_s8 = smov [#allocation3]  }
  0x33   : > { %p1283_p1 = scmp.ne.s32.totalorder %s1509_s10, %s1282_s19  ;;  %s1287_s7 = sshll.u32 %s1370_s8, 4  ;;  %s1288_s7 = int_to_ptr.vmem [resolvable:$false] %s1287_s7 }
  0x34   : > { %s1289_s15 = scalar_lea.vmem %s1288_s7, 2048  ;;  %p1290_p9 = scmp.lt.s32.totalorder %s1509_s10, %s1288_s7 }
  0x35   : > { %p1285_p6 = pnand %p1283_p1, %p1271_p7  ;;  %p1291_p3 = scmp.lt.s32.totalorder %s1289_s15, %s1282_s19 }
  0x37   : > { %p1286_p5 = pneg %p1285_p6  ;;  %p1292_p4 = por %p1291_p3, %p1290_p9 }
  0x39   : > { %p1293_p8 = pnand %p1292_p4, %p1286_p5 }
  0x3b   : > { %1296 = shalt.err (!%p1293_p8)
}
  0x3c   : > { %s1371_s14 = smov 128   ;;  %s1372_s16 = smov 8  }
  0x3d   : > { %1173 = dma.hbm_to_vmem [thread:$0]  (!%p1505_p11), %s1503_s12, 1024, %s1509_s10, %s1511_s13, %s1371_s14, %s1371_s14, %s1372_s16  }
  0x3e   : > { %p1915_p1 = scmp.ne.s32.totalorder %s1910_s29, 0 }
  0x3f   : > { %s1535_s20 = sand.u32 (!%p1915_p1), 1, %s1357_s22   ;;  %p1916_p4 = scmp.ne.s32.totalorder (!%p1915_p1), %s1908_s27, 0 }
  0x40   : > { %246 = sbr.rel (%p1915_p1) target bundleno = 1377 (0x561), region = 44  ;;  %s1127_s26 = sshll.u32 (!%p1915_p1), %s1535_s20, 6 }
  0x41   : > { %s249_s30 = scalar_lea.sflag (!%p1915_p1), [#allocation4], %s1535_s20  ;;  %s252_s19 = scalar_lea.vmem (!%p1915_p1), [#allocation3], %s1127_s26 }
  0x45   : > { %1340 = dma.done.wait (%p1916_p4), %s249_s30, 1024  }
  0x46   : > { %1342 = vsyncadd (%p1916_p4), %s249_s30, 4294966272  ;;  %p1917_p6 = scmp.eq.s32.totalorder %s1440_s25, 0 }
  0x48   : > { %1344 = dma.done.wait (%p1917_p6), [#allocation7], 2304   ;;  %p1918_p8 = pmov %p1917_p6 }
  0x49   : > { %v1373_v0 = vmov 0   ;;  %v1231_v1 = vld [vmem:[%s252_s19 + $0x34] ss:$8 sps:$4 sm:$0xff]   ;;  %v1233_v2 = vld [vmem:[%s252_s19 + $0x30] ss:$8 sps:$4 sm:$0xff]   ;;  %v295_v6 = vld [vmem:[%s1902_s5] sm:$0xff]  ;;  %v392_v23 = vlaneseq }
  0x4a   : > { %1346 = vsyncadd (%p1918_p8), [#allocation7], 4294964992  ;;  %377 = vmatprep.mubr.bf16.mxu0 %v1373_v0  ;;  %1229 = vset.pattern.permute.xlu0 %v1373_v0  ;;  %v1234_v3 = vld [vmem:[%s252_s19 + $0x24] ss:$8 sps:$4 sm:$0xff]   ;;  %v1236_v4 = vld [vmem:[%s252_s19 + $0x20] ss:$8 sps:$4 sm:$0xff]  }
  0x4b   : > { %579 = vmatprep.mubr.bf16.mxu1 %v1373_v0  ;;  %1230 = vset.pattern.permute.xlu1 %v1373_v0  ;;  %v1237_v5 = vld [vmem:[%s252_s19 + $0x14] ss:$8 sps:$4 sm:$0xff]   ;;  %v1239_v7 = vld [vmem:[%s252_s19 + $0x10] ss:$8 sps:$4 sm:$0xff]   ;;  %v1240_v8 = vld [vmem:[%s252_s19 + $0x4] ss:$8 sps:$4 sm:$0xff]  }
  0x4c   : > { %353 = vmatprep.subr.bf16.mxu0 %v1231_v1  ;;  %298 = vperm.xlu0 %1229, %v295_v6   ;;  %v1242_v9 = vld [vmem:[%s252_s19] ss:$8 sps:$4 sm:$0xff]   ;;  %vm341_vm0 = vcmask 523264   ;;  %s1374_s11 = smov 98   ;;  %s1375_s13 = smov 94   ;;  %v1598_v26 = vand.u32 127, %v392_v23 }
  0x4d   : > { %354 = vmatpush1.bf16.msra.mxu0 %v1233_v2  ;;  %v294_v10 = vld [vmem:[%s1899_s2] sm:$0xf]  ;;  %s1376_s8 = smov 96   ;;  %s1377_s7 = smov 126   ;;  %v1139_v20 = vld [vmem:[%s1902_s5 + $0x8] sm:$0xff]  ;;  %v1603_v29 = vld [vmem:[#allocation6 + $0x78] sm:$0xff] }
  0x4e   : > { %355 = vmatprep.subr.bf16.mxu0 %v1234_v3  ;;  %s1378_s15 = smov 30   ;;  %s1379_s14 = smov 2   ;;  %vm450_vm1 = vcmp.lt.s32.totalorder %v1598_v26, 96  ;;  %vm441_vm2 = vcmp.lt.s32.totalorder %v1598_v26, 98  ;;  %vm459_vm3 = vcmp.lt.s32.totalorder %v1598_v26, 94  ;;  %v1607_v31 = vld [vmem:[#allocation6 + $0x80] sm:$0xff] }
  0x4f   : > { %s1380_s16 = smov 34   ;;  %s1381_s26 = smov 32   ;;  %v1609_v32 = vld [vmem:[#allocation6 + $0x88] sm:$0xff]  ;;  %vm432_vm4 = vcmp.lt.s32.totalorder %v1598_v26, 126  ;;  %v1620_v39 = vld [vmem:[#allocation6 + $0x70] sm:$0xff]  ;;  %v1627_v44 = vld [vmem:[#allocation6 + $0x58] sm:$0xff] }
  0x50   : > { %v1612_v35 = vld [vmem:[#allocation6 + $0x68] sm:$0xff]  ;;  %vm540_vm5 = vcmask 1043456   ;;  %v1631_v46 = vld [vmem:[#allocation6 + $0x60] sm:$0xff]  ;;  %vm412_vm6 = vcmp.lt.s32.totalorder %v1598_v26, 30  ;;  %vm421_vm7 = vcmp.lt.s32.totalorder %v1598_v26, 2  ;;  %v1641_v55 = vld [vmem:[#allocation6 + $0x50] sm:$0xff] }
  0x51   : > { %356 = vmatpush1.bf16.msra.mxu0 %v1236_v4  ;;  %v1639_v54 = vld [vmem:[#allocation6 + $0x48] sm:$0xff]  ;;  %v1649_v61 = vld [vmem:[#allocation6 + $0x38] sm:$0xff]  ;;  %v1653_v2 = vld [vmem:[#allocation6 + $0x40] sm:$0xff]  ;;  %vm394_vm8 = vcmp.lt.s32.totalorder %v1598_v26, 34  ;;  %vm403_vm9 = vcmp.lt.s32.totalorder %v1598_v26, 32  ;;  %vm536_vm10 = vcmask 588800  }
  0x52   : > { %357 = vmatprep.subr.bf16.mxu0 %v1237_v5  ;;  %v1656_v4 = vld [vmem:[#allocation6 + $0x28] sm:$0xff]  ;;  %s1157_s29 = sshll.u32 %s1440_s25, 5  ;;  %vm1021_vm11 = vcmp.lt.s32.totalorder %v392_v23, 256  ;;  %p1919_p11 = scmp.ne.s32.totalorder %s1913_s18, 0 }
  0x55   : > { %358 = vmatpush1.bf16.msra.mxu0 %v1239_v7 }
  0x56   : > { %359 = vmatprep.subr.bf16.mxu0 %v1240_v8  ;;  %v1662_v8 = vld [vmem:[#allocation6 + $0x30] sm:$0xff] }
  0x59   : > { %360 = vmatpush1.bf16.msra.mxu0 %v1242_v9 }
  0x5c   : > { %1138 = vmatmul.mubr.msk.bf16.vlgmr.msra.gmra.mxu0 %vm341_vm0, %v294_v10 }
  0x5d   : > { %770 = vmatprep.mubr.bf16.mxu0 %v1373_v0 }
  0xc7   : > { %v299_v11 = vpop.permute.xlu0 %298 }
 0x11c   : > { %v379_v12 = vpop.f32.mrf.mxu0 }
 0x11d   : > { %v380_v13 = vadd.f32 %v379_v12, %v299_v11 }
 0x11e   : > { %v381_v14 = vpop.f32.mrf.mxu0 }
 0x11f   : > { %v1558_v15 = vmax.f32 %v380_v13, 0.0  ;;  %v382_v16 = vadd.f32 %v381_v14, %v299_v11  ;;  %v1669_v13 = vld [vmem:[#allocation6 + $0x20] sm:$0xff] }
 0x120   : > { %v383_v17 = vpop.f32.mrf.mxu0 }
 0x121   : > { %437 = vrot.lane.b32.xlu1 %v1558_v15, %s1374_s11  ;;  %455 = vrot.lane.b32.xlu0 %v1558_v15, %s1375_s13  ;;  %v1564_v19 = vmax.f32 %v382_v16, 0.0  ;;  %v508_v12 = vmul.f32 %v1653_v2, %v1558_v15 }
 0x122   : > { %v384_v18 = vpop.f32.mrf.mxu0 }
 0x123   : > { %v509_v1 = vmul.f32 %v1639_v54, %v1564_v19 }
 0x125   : > { %446 = vrot.lane.b32.xlu1 %v1558_v15, %s1376_s8  ;;  %439 = vrot.lane.b32.xlu0 %v1564_v19, %s1374_s11 }
 0x129   : > { %428 = vrot.lane.b32.xlu1 %v1558_v15, %s1377_s7  ;;  %448 = vrot.lane.b32.xlu0 %v1564_v19, %s1376_s8 }
 0x12d   : > { %457 = vrot.lane.b32.xlu1 %v1564_v19, %s1375_s13  ;;  %430 = vrot.lane.b32.xlu0 %v1564_v19, %s1377_s7 }
 0x131   : > { %408 = vrot.lane.b32.xlu1 %v1558_v15, %s1378_s15  ;;  %410 = vrot.lane.b32.xlu0 %v1564_v19, %s1378_s15 }
 0x135   : > { %417 = vrot.lane.b32.xlu1 %v1558_v15, %s1379_s14  ;;  %419 = vrot.lane.b32.xlu0 %v1564_v19, %s1379_s14 }
 0x139   : > { %388 = vrot.lane.b32.xlu1 %v1558_v15, %s1380_s16  ;;  %390 = vrot.lane.b32.xlu0 %v1564_v19, %s1380_s16 }
 0x13d   : > { %399 = vrot.lane.b32.xlu1 %v1558_v15, %s1381_s26  ;;  %401 = vrot.lane.b32.xlu0 %v1564_v19, %s1381_s26 }
 0x141   : > { %533 = vperm.xlu1 %1230, %v1139_v20  }
 0x193   : > { %v438_v21 = vpop.permute.xlu1 %437  ;;  %v456_v22 = vpop.permute.xlu0 %455 }
 0x197   : > { %v447_v24 = vpop.permute.xlu1 %446  ;;  %v440_v25 = vpop.permute.xlu0 %439 }
 0x198   : > { %v443_v36 = vsel %vm441_vm2, %v440_v25, %v438_v21  ;;  %v442_v47 = vsel %vm441_vm2, %v438_v21, %v440_v25  ;;  %v1676_v21 = vld [vmem:[#allocation6] sm:$0xff] }
 0x199   : > { %v513_v48 = vmul.f32 %v1612_v35, %v443_v36  ;;  %v512_v60 = vmul.f32 %v1631_v46, %v442_v47 }
 0x19b   : > { %v429_v27 = vpop.permute.xlu1 %428  ;;  %v449_v28 = vpop.permute.xlu0 %448 }
 0x19c   : > { %v452_v30 = vsel %vm450_vm1, %v449_v28, %v447_v24  ;;  %v451_v40 = vsel %vm450_vm1, %v447_v24, %v449_v28  ;;  %v1680_v24 = vld [vmem:[#allocation6 + $0x8] sm:$0xff]  ;;  %v1686_v28 = vld [vmem:[#allocation6 + $0x10] sm:$0xff] }
 0x19d   : > { %v515_v41 = vmul.f32 %v1603_v29, %v452_v30  ;;  %v514_v53 = vmul.f32 %v1620_v39, %v451_v40  ;;  %v1688_v30 = vld [vmem:[#allocation6 + $0x18] sm:$0xff] }
 0x19f   : > { %v458_v33 = vpop.permute.xlu1 %457  ;;  %v431_v34 = vpop.permute.xlu0 %430  ;;  %v525_v59 = vpack.c.bf16 %v515_v41, %v513_v48  ;;  %v524_v7 = vpack.c.bf16 %v514_v53, %v512_v60  ;;  %v528_v48 = vld [vmem:[%s1900_s3] sm:$0xf] }
 0x1a0   : > { %v460_v37 = vsel %vm459_vm3, %v456_v22, %v458_v33  ;;  %v461_v38 = vsel %vm459_vm3, %v458_v33, %v456_v22  ;;  %v434_v45 = vsel %vm432_vm4, %v431_v34, %v429_v27  ;;  %v433_v56 = vsel %vm432_vm4, %v429_v27, %v431_v34 }
 0x1a1   : > { %v516_v42 = vmul.f32 %v1607_v31, %v460_v37  ;;  %v517_v43 = vmul.f32 %v1609_v32, %v461_v38  ;;  %v511_v57 = vmul.f32 %v1627_v44, %v434_v45  ;;  %v510_v3 = vmul.f32 %v1641_v55, %v433_v56 }
 0x1a3   : > { %v409_v49 = vpop.permute.xlu1 %408  ;;  %v411_v50 = vpop.permute.xlu0 %410  ;;  %v527_v51 = vpack.c.bf16 %v517_v43, %v517_v43  ;;  %v526_v52 = vpack.c.bf16 %v516_v42, %v516_v42  ;;  %v523_v11 = vpack.c.bf16 %v511_v57, %v509_v1  ;;  %v522_v20 = vpack.c.bf16 %v510_v3, %v508_v12 }
 0x1a4   : > { %v413_v5 = vsel %vm412_vm6, %v409_v49, %v411_v50  ;;  %v414_v14 = vsel %vm412_vm6, %v411_v50, %v409_v49 }
 0x1a5   : > { %1140 = vmatprep.subr.msk.bf16.mxu1 %vm540_vm5, %v527_v51  ;;  %v542_v58 = vsel %vm540_vm5, %v526_v52, 0  ;;  %v505_v16 = vmul.f32 %v1656_v4, %v413_v5  ;;  %v504_v22 = vmul.f32 %v1669_v13, %v414_v14 }
 0x1a6   : > { %554 = vmatpush1.bf16.msra.mxu1 %v542_v58 }
 0x1a7   : > { %v418_v62 = vpop.permute.xlu1 %417  ;;  %555 = vmatprep.subr.bf16.mxu1 %v525_v59  ;;  %v420_v63 = vpop.permute.xlu0 %419 }
 0x1a8   : > { %v422_v6 = vsel %vm421_vm7, %v418_v62, %v420_v63  ;;  %v423_v9 = vsel %vm421_vm7, %v420_v63, %v418_v62 }
 0x1a9   : > { %v507_v10 = vmul.f32 %v1649_v61, %v422_v6  ;;  %v506_v19 = vmul.f32 %v1662_v8, %v423_v9 }
 0x1aa   : > { %556 = vmatpush1.bf16.msra.mxu1 %v524_v7 }
 0x1ab   : > { %v389_v17 = vpop.permute.xlu1 %388  ;;  %557 = vmatprep.subr.bf16.mxu1 %v523_v11  ;;  %v391_v18 = vpop.permute.xlu0 %390  ;;  %v521_v15 = vpack.c.bf16 %v507_v10, %v505_v16  ;;  %v520_v38 = vpack.c.bf16 %v506_v19, %v504_v22 }
 0x1ac   : > { %v395_v25 = vsel %vm394_vm8, %v389_v17, %v391_v18  ;;  %v396_v27 = vsel %vm394_vm8, %v391_v18, %v389_v17 }
 0x1ad   : > { %v500_v40 = vmul.f32 %v1676_v21, %v396_v27  ;;  %v501_v41 = vmul.f32 %v1680_v24, %v395_v25 }
 0x1ae   : > { %558 = vmatpush1.bf16.msra.mxu1 %v522_v20 }
 0x1af   : > { %v400_v33 = vpop.permute.xlu1 %399  ;;  %v402_v34 = vpop.permute.xlu0 %401  ;;  %559 = vmatprep.subr.bf16.mxu1 %v521_v15 }
 0x1b0   : > { %v404_v36 = vsel %vm403_vm9, %v400_v33, %v402_v34  ;;  %v405_v37 = vsel %vm403_vm9, %v402_v34, %v400_v33 }
 0x1b1   : > { %v502_v42 = vmul.f32 %v1686_v28, %v405_v37  ;;  %v503_v43 = vmul.f32 %v1688_v30, %v404_v36 }
 0x1b2   : > { %560 = vmatpush1.bf16.msra.mxu1 %v520_v38 }
 0x1b3   : > { %v519_v45 = vpack.c.bf16 %v503_v43, %v501_v41  ;;  %v518_v47 = vpack.c.bf16 %v502_v42, %v500_v40 }
 0x1b5   : > { %561 = vmatprep.subr.bf16.mxu1 %v519_v45 }
 0x1b6   : > { %562 = vmatpush1.bf16.msra.mxu1 %v518_v47 }
 0x1b9   : > { %1141 = vmatmul.mubr.msk.bf16.vlgmr.msra.gmra.mxu1 %vm536_vm10, %v528_v48 }
 0x1ba   : > { %961 = vmatprep.mubr.bf16.mxu1 %v1373_v0  ;;  %v1143_v0 = vld [vmem:[%s1902_s5 + $0x10] sm:$0xff] }
 0x1bc   : > { %v534_v49 = vpop.permute.xlu1 %533 }
 0x279   : > { %v581_v50 = vpop.f32.mrf.mxu1 }
 0x27a   : > { %v582_v51 = vadd.f32 %v581_v50, %v534_v49 }
 0x27b   : > { %v583_v52 = vpop.f32.mrf.mxu1 }
 0x27c   : > { %v588_v53 = vmax.f32 %v582_v51, 0.0  ;;  %v584_v56 = vadd.f32 %v583_v52, %v534_v49 }
 0x27d   : > { %v585_v57 = vpop.f32.mrf.mxu1 }
 0x27e   : > { %v589_v58 = vmax.f32 %v584_v56, 0.0  ;;  %648 = vrot.lane.b32.xlu0 %v588_v53, %s1375_s13  ;;  %v700_v40 = vmul.f32 %v588_v53, %v1653_v2 }
 0x27f   : > { %v586_v59 = vpop.f32.mrf.mxu1 }
 0x280   : > { %650 = vrot.lane.b32.xlu1 %v589_v58, %s1375_s13  ;;  %v701_v45 = vmul.f32 %v589_v58, %v1639_v54 }
 0x282   : > { %632 = vrot.lane.b32.xlu0 %v588_v53, %s1374_s11 }
 0x284   : > { %634 = vrot.lane.b32.xlu1 %v589_v58, %s1374_s11 }
 0x286   : > { %640 = vrot.lane.b32.xlu0 %v588_v53, %s1376_s8 }
 0x288   : > { %642 = vrot.lane.b32.xlu1 %v589_v58, %s1376_s8 }
 0x28a   : > { %624 = vrot.lane.b32.xlu0 %v588_v53, %s1377_s7 }
 0x28c   : > { %626 = vrot.lane.b32.xlu1 %v589_v58, %s1377_s7 }
 0x28e   : > { %606 = vrot.lane.b32.xlu0 %v588_v53, %s1378_s15 }
 0x290   : > { %608 = vrot.lane.b32.xlu1 %v589_v58, %s1378_s15 }
 0x292   : > { %614 = vrot.lane.b32.xlu0 %v588_v53, %s1379_s14 }
 0x294   : > { %616 = vrot.lane.b32.xlu1 %v589_v58, %s1379_s14 }
 0x296   : > { %590 = vrot.lane.b32.xlu0 %v588_v53, %s1380_s16 }
 0x298   : > { %592 = vrot.lane.b32.xlu1 %v589_v58, %s1380_s16 }
 0x29a   : > { %598 = vrot.lane.b32.xlu0 %v588_v53, %s1381_s26 }
 0x29c   : > { %600 = vrot.lane.b32.xlu1 %v589_v58, %s1381_s26 }
 0x29e   : > { %726 = vperm.xlu0 %1229, %v1143_v0  }
 0x2f0   : > { %v649_v60 = vpop.permute.xlu0 %648 }
 0x2f2   : > { %v651_v62 = vpop.permute.xlu1 %650 }
 0x2f3   : > { %v652_v63 = vsel %vm459_vm3, %v649_v60, %v651_v62  ;;  %v653_v1 = vsel %vm459_vm3, %v651_v62, %v649_v60 }
 0x2f4   : > { %v708_v3 = vmul.f32 %v652_v63, %v1607_v31  ;;  %v709_v5 = vmul.f32 %v653_v1, %v1609_v32  ;;  %v633_v6 = vpop.permute.xlu0 %632 }
 0x2f6   : > { %v718_v7 = vpack.c.bf16 %v708_v3, %v708_v3  ;;  %v719_v9 = vpack.c.bf16 %v709_v5, %v709_v5  ;;  %v635_v10 = vpop.permute.xlu1 %634 }
 0x2f7   : > { %v636_v14 = vsel %vm441_vm2, %v633_v6, %v635_v10  ;;  %v637_v16 = vsel %vm441_vm2, %v635_v10, %v633_v6 }
 0x2f8   : > { %1144 = vmatprep.subr.msk.bf16.mxu0 %vm540_vm5, %v719_v9  ;;  %v641_v11 = vpop.permute.xlu0 %640  ;;  %v733_v12 = vsel %vm540_vm5, %v718_v7, 0  ;;  %v704_v20 = vmul.f32 %v636_v14, %v1631_v46  ;;  %v705_v15 = vmul.f32 %v637_v16, %v1612_v35 }
 0x2f9   : > { %745 = vmatpush1.bf16.msra.mxu0 %v733_v12 }
 0x2fa   : > { %v643_v17 = vpop.permute.xlu1 %642 }
 0x2fb   : > { %v644_v18 = vsel %vm450_vm1, %v641_v11, %v643_v17  ;;  %v645_v19 = vsel %vm450_vm1, %v643_v17, %v641_v11 }
 0x2fc   : > { %v706_v22 = vmul.f32 %v644_v18, %v1620_v39  ;;  %v707_v25 = vmul.f32 %v645_v19, %v1603_v29  ;;  %v625_v27 = vpop.permute.xlu0 %624 }
 0x2fe   : > { %v716_v33 = vpack.c.bf16 %v706_v22, %v704_v20  ;;  %v627_v34 = vpop.permute.xlu1 %626  ;;  %v717_v36 = vpack.c.bf16 %v707_v25, %v705_v15  ;;  %v1142_v20 = vld [vmem:[%s1900_s3 + $0x4] sm:$0xf] }
 0x2ff   : > { %v628_v37 = vsel %vm432_vm4, %v625_v27, %v627_v34  ;;  %v629_v38 = vsel %vm432_vm4, %v627_v34, %v625_v27 }
 0x300   : > { %v702_v41 = vmul.f32 %v628_v37, %v1641_v55  ;;  %v703_v42 = vmul.f32 %v629_v38, %v1627_v44  ;;  %746 = vmatprep.subr.bf16.mxu0 %v717_v36  ;;  %v607_v43 = vpop.permute.xlu0 %606 }
 0x301   : > { %747 = vmatpush1.bf16.msra.mxu0 %v716_v33 }
 0x302   : > { %v714_v47 = vpack.c.bf16 %v702_v41, %v700_v40  ;;  %v609_v48 = vpop.permute.xlu1 %608  ;;  %v715_v49 = vpack.c.bf16 %v703_v42, %v701_v45  ;;  %v1147_v40 = vld [vmem:[%s1902_s5 + $0x18] sm:$0xff]  ;;  %v972_v41 = vld [vmem:[%s1901_s4] sm:$0xff] }
 0x303   : > { %v610_v51 = vsel %vm412_vm6, %v607_v43, %v609_v48  ;;  %v611_v52 = vsel %vm412_vm6, %v609_v48, %v607_v43  ;;  %v1150_v42 = vld [vmem:[%s1902_s5 + $0x20] sm:$0xff] }
 0x304   : > { %748 = vmatprep.subr.bf16.mxu0 %v715_v49  ;;  %v615_v50 = vpop.permute.xlu0 %614  ;;  %v696_v58 = vmul.f32 %v611_v52, %v1669_v13  ;;  %v697_v59 = vmul.f32 %v610_v51, %v1656_v4 }
 0x305   : > { %749 = vmatpush1.bf16.msra.mxu0 %v714_v47 }
 0x306   : > { %v617_v53 = vpop.permute.xlu1 %616 }
 0x307   : > { %v618_v56 = vsel %vm421_vm7, %v615_v50, %v617_v53  ;;  %v619_v57 = vsel %vm421_vm7, %v617_v53, %v615_v50 }
 0x308   : > { %v698_v0 = vmul.f32 %v619_v57, %v1662_v8  ;;  %v699_v60 = vmul.f32 %v618_v56, %v1649_v61  ;;  %v591_v62 = vpop.permute.xlu0 %590 }
 0x30a   : > { %v712_v63 = vpack.c.bf16 %v698_v0, %v696_v58  ;;  %v593_v1 = vpop.permute.xlu1 %592  ;;  %v713_v3 = vpack.c.bf16 %v699_v60, %v697_v59 }
 0x30b   : > { %v594_v5 = vsel %vm394_vm8, %v591_v62, %v593_v1  ;;  %v595_v6 = vsel %vm394_vm8, %v593_v1, %v591_v62 }
 0x30c   : > { %750 = vmatprep.subr.bf16.mxu0 %v713_v3  ;;  %v599_v7 = vpop.permute.xlu0 %598  ;;  %v692_v12 = vmul.f32 %v595_v6, %v1676_v21  ;;  %v693_v14 = vmul.f32 %v594_v5, %v1680_v24 }
 0x30d   : > { %751 = vmatpush1.bf16.msra.mxu0 %v712_v63 }
 0x30e   : > { %v601_v9 = vpop.permute.xlu1 %600 }
 0x30f   : > { %v602_v10 = vsel %vm403_vm9, %v599_v7, %v601_v9  ;;  %v603_v11 = vsel %vm403_vm9, %v601_v9, %v599_v7 }
 0x310   : > { %v694_v16 = vmul.f32 %v603_v11, %v1686_v28  ;;  %v695_v17 = vmul.f32 %v602_v10, %v1688_v30 }
 0x312   : > { %v710_v18 = vpack.c.bf16 %v694_v16, %v692_v12  ;;  %v711_v19 = vpack.c.bf16 %v695_v17, %v693_v14 }
 0x314   : > { %752 = vmatprep.subr.bf16.mxu0 %v711_v19 }
 0x315   : > { %753 = vmatpush1.bf16.msra.mxu0 %v710_v18 }
 0x318   : > { %1145 = vmatmul.mubr.msk.bf16.vlgmr.msra.gmra.mxu0 %vm536_vm10, %v1142_v20 }
 0x319   : > { %v727_v15 = vpop.permute.xlu0 %726 }
 0x3d8   : > { %v772_v22 = vpop.f32.mrf.mxu0 }
 0x3d9   : > { %v773_v25 = vadd.f32 %v772_v22, %v727_v15 }
 0x3da   : > { %v774_v27 = vpop.f32.mrf.mxu0 }
 0x3db   : > { %v779_v33 = vmax.f32 %v773_v25, 0.0  ;;  %v775_v34 = vadd.f32 %v774_v27, %v727_v15 }
 0x3dc   : > { %v776_v36 = vpop.f32.mrf.mxu0 }
 0x3dd   : > { %v780_v37 = vmax.f32 %v775_v34, 0.0  ;;  %839 = vrot.lane.b32.xlu1 %v779_v33, %s1375_s13  ;;  %v891_v12 = vmul.f32 %v779_v33, %v1653_v2 }
 0x3de   : > { %v777_v38 = vpop.f32.mrf.mxu0 }
 0x3df   : > { %841 = vrot.lane.b32.xlu0 %v780_v37, %s1375_s13  ;;  %s1025_s13 = scalar_lea.sflag [#allocation5], %s1535_s20 }
 0x3e1   : > { %823 = vrot.lane.b32.xlu1 %v779_v33, %s1374_s11 }
 0x3e3   : > { %825 = vrot.lane.b32.xlu0 %v780_v37, %s1374_s11  ;;  %s1037_s11 = scalar_lea.hbm %s1903_s6, %s1157_s29 }
 0x3e5   : > { %831 = vrot.lane.b32.xlu1 %v779_v33, %s1376_s8 }
 0x3e7   : > { %833 = vrot.lane.b32.xlu0 %v780_v37, %s1376_s8 }
 0x3e9   : > { %815 = vrot.lane.b32.xlu1 %v779_v33, %s1377_s7 }
 0x3eb   : > { %817 = vrot.lane.b32.xlu0 %v780_v37, %s1377_s7  ;;  %s1383_s7 = smov [#allocation8]  }
 0x3ec   : > { %s1301_s25 = sshll.u32 %s1383_s7, 4  ;;  %s1302_s25 = int_to_ptr.vmem [resolvable:$false] %s1301_s25 }
 0x3ed   : > { %797 = vrot.lane.b32.xlu1 %v779_v33, %s1378_s15 }
 0x3ef   : > { %799 = vrot.lane.b32.xlu0 %v780_v37, %s1378_s15  ;;  %s1303_s15 = scalar_lea.vmem %s1302_s25, 64 }
 0x3f1   : > { %805 = vrot.lane.b32.xlu1 %v779_v33, %s1379_s14 }
 0x3f3   : > { %807 = vrot.lane.b32.xlu0 %v780_v37, %s1379_s14 }
 0x3f5   : > { %781 = vrot.lane.b32.xlu1 %v779_v33, %s1380_s16 }
 0x3f7   : > { %783 = vrot.lane.b32.xlu0 %v780_v37, %s1380_s16 }
 0x3f9   : > { %789 = vrot.lane.b32.xlu1 %v779_v33, %s1381_s26 }
 0x3fb   : > { %791 = vrot.lane.b32.xlu0 %v780_v37, %s1381_s26  ;;  %s1129_s26 = sshll.u32 %s1535_s20, 1 }
 0x3fc   : > { %s284_s12 = scalar_lea.vmem [#allocation8], %s1129_s26 }
 0x3fd   : > { %917 = vperm.xlu1 %1230, %v1147_v40   ;;  %s1039_s10 = sshll.u32 %s284_s12, 4  ;;  %s1040_s10 = int_to_ptr.vmem [resolvable:$true] %s1039_s10 }
 0x3fe   : > { %s1297_s8 = scalar_lea.vmem %s1040_s10, 32  ;;  %p1304_p10 = scmp.lt.s32.totalorder %s1040_s10, %s1302_s25 }
 0x3ff   : > { %975 = vperm.xlu0 %1229, %v972_v41   ;;  %p1298_p3 = scmp.ne.s32.totalorder %s1040_s10, %s1297_s8  ;;  %p1305_p2 = scmp.lt.s32.totalorder %s1303_s15, %s1297_s8 }
 0x401   : > { %996 = vperm.xlu1 %1230, %v1150_v42   ;;  %p1299_p7 = pnand %p1298_p3, %p1919_p11  ;;  %p1306_p13 = por %p1305_p2, %p1304_p10 }
 0x403   : > { %p1300_p12 = pneg %p1299_p7 }
 0x405   : > { %p1307_p0 = pnand %p1306_p13, %p1300_p12 }
 0x44f   : > { %v840_v43 = vpop.permute.xlu1 %839 }
 0x451   : > { %v842_v45 = vpop.permute.xlu0 %841 }
 0x452   : > { %v843_v47 = vsel %vm459_vm3, %v840_v43, %v842_v45  ;;  %v844_v48 = vsel %vm459_vm3, %v842_v45, %v840_v43 }
 0x453   : > { %v899_v49 = vmul.f32 %v843_v47, %v1607_v31  ;;  %v900_v50 = vmul.f32 %v844_v48, %v1609_v32  ;;  %v824_v51 = vpop.permute.xlu1 %823  ;;  %v1146_v48 = vld [vmem:[%s1900_s3 + $0x8] sm:$0xf] }
 0x455   : > { %v909_v52 = vpack.c.bf16 %v899_v49, %v899_v49  ;;  %v910_v53 = vpack.c.bf16 %v900_v50, %v900_v50  ;;  %v826_v56 = vpop.permute.xlu0 %825 }
 0x456   : > { %v827_v59 = vsel %vm441_vm2, %v824_v51, %v826_v56  ;;  %v828_v0 = vsel %vm441_vm2, %v826_v56, %v824_v51 }
 0x457   : > { %1148 = vmatprep.subr.msk.bf16.mxu1 %vm540_vm5, %v910_v53  ;;  %v832_v57 = vpop.permute.xlu1 %831  ;;  %v924_v58 = vsel %vm540_vm5, %v909_v52, 0  ;;  %v895_v62 = vmul.f32 %v827_v59, %v1631_v46  ;;  %v896_v63 = vmul.f32 %v828_v0, %v1612_v35 }
 0x458   : > { %936 = vmatpush1.bf16.msra.mxu1 %v924_v58 }
 0x459   : > { %v834_v60 = vpop.permute.xlu0 %833 }
 0x45a   : > { %v835_v31 = vsel %vm450_vm1, %v832_v57, %v834_v60  ;;  %v836_v32 = vsel %vm450_vm1, %v834_v60, %v832_v57 }
 0x45b   : > { %v897_v1 = vmul.f32 %v835_v31, %v1620_v39  ;;  %v898_v3 = vmul.f32 %v836_v32, %v1603_v29  ;;  %v816_v5 = vpop.permute.xlu1 %815  ;;  %v892_v29 = vmul.f32 %v780_v37, %v1639_v54 }
 0x45d   : > { %v907_v6 = vpack.c.bf16 %v897_v1, %v895_v62  ;;  %v818_v7 = vpop.permute.xlu0 %817  ;;  %v908_v9 = vpack.c.bf16 %v898_v3, %v896_v63  ;;  %v1382_v63 = vmov 1966171168  }
 0x45e   : > { %v819_v10 = vsel %vm432_vm4, %v816_v5, %v818_v7  ;;  %v820_v11 = vsel %vm432_vm4, %v818_v7, %v816_v5  ;;  %v1005_v1 = vunpack.c.l.s4 %v1382_v63 }
 0x45f   : > { %v893_v46 = vmul.f32 %v819_v10, %v1641_v55  ;;  %v894_v35 = vmul.f32 %v820_v11, %v1627_v44  ;;  %937 = vmatprep.subr.bf16.mxu1 %v908_v9  ;;  %v798_v39 = vpop.permute.xlu1 %797  ;;  %v1008_v10 = vshrl.u32 %v392_v23, 7 }
 0x460   : > { %938 = vmatpush1.bf16.msra.mxu1 %v907_v6  ;;  %v1006_v9 = vunpack.c.0.s8 %v1005_v1 }
 0x461   : > { %v905_v14 = vpack.c.bf16 %v893_v46, %v891_v12  ;;  %v800_v16 = vpop.permute.xlu0 %799  ;;  %v906_v17 = vpack.c.bf16 %v894_v35, %v892_v29 }
 0x462   : > { %v801_v19 = vsel %vm412_vm6, %v798_v39, %v800_v16  ;;  %v802_v2 = vsel %vm412_vm6, %v800_v16, %v798_v39  ;;  %v1009_v39 = vsub.s32 %v1006_v9, %v1008_v10 }
 0x463   : > { %939 = vmatprep.subr.bf16.mxu1 %v906_v17  ;;  %v806_v18 = vpop.permute.xlu1 %805  ;;  %v887_v20 = vmul.f32 %v802_v2, %v1669_v13  ;;  %v888_v15 = vmul.f32 %v801_v19, %v1656_v4 }
 0x464   : > { %940 = vmatpush1.bf16.msra.mxu1 %v905_v14 }
 0x465   : > { %v808_v55 = vpop.permute.xlu0 %807 }
 0x466   : > { %v809_v44 = vsel %vm421_vm7, %v806_v18, %v808_v55  ;;  %v810_v54 = vsel %vm421_vm7, %v808_v55, %v806_v18 }
 0x467   : > { %v889_v22 = vmul.f32 %v810_v54, %v1662_v8  ;;  %v890_v25 = vmul.f32 %v809_v44, %v1649_v61  ;;  %v782_v27 = vpop.permute.xlu1 %781 }
 0x469   : > { %v903_v33 = vpack.c.bf16 %v889_v22, %v887_v20  ;;  %v784_v34 = vpop.permute.xlu0 %783  ;;  %v904_v36 = vpack.c.bf16 %v890_v25, %v888_v15 }
 0x46a   : > { %v785_v37 = vsel %vm394_vm8, %v782_v27, %v784_v34  ;;  %v786_v38 = vsel %vm394_vm8, %v784_v34, %v782_v27 }
 0x46b   : > { %941 = vmatprep.subr.bf16.mxu1 %v904_v36  ;;  %v790_v40 = vpop.permute.xlu1 %789  ;;  %v883_v8 = vmul.f32 %v786_v38, %v1676_v21  ;;  %v884_v41 = vmul.f32 %v785_v37, %v1680_v24 }
 0x46c   : > { %942 = vmatpush1.bf16.msra.mxu1 %v903_v33 }
 0x46d   : > { %v792_v13 = vpop.permute.xlu0 %791 }
 0x46e   : > { %v793_v4 = vsel %vm403_vm9, %v790_v40, %v792_v13  ;;  %v794_v61 = vsel %vm403_vm9, %v792_v13, %v790_v40 }
 0x46f   : > { %v885_v42 = vmul.f32 %v794_v61, %v1686_v28  ;;  %v886_v43 = vmul.f32 %v793_v4, %v1688_v30 }
 0x471   : > { %v901_v45 = vpack.c.bf16 %v885_v42, %v883_v8  ;;  %v902_v47 = vpack.c.bf16 %v886_v43, %v884_v41 }
 0x473   : > { %943 = vmatprep.subr.bf16.mxu1 %v902_v47 }
 0x474   : > { %944 = vmatpush1.bf16.msra.mxu1 %v901_v45 }
 0x477   : > { %1149 = vmatmul.mubr.msk.bf16.vlgmr.msra.gmra.mxu1 %vm536_vm10, %v1146_v48 }
 0x478   : > { %v918_v26 = vpop.permute.xlu1 %917 }
 0x47a   : > { %v976_v52 = vpop.permute.xlu0 %975 }
 0x47c   : > { %v997_v12 = vpop.permute.xlu1 %996 }
 0x537   : > { %v963_v49 = vpop.f32.mrf.mxu1 }
 0x538   : > { %v964_v50 = vadd.f32 %v963_v49, %v918_v26 }
 0x539   : > { %v965_v21 = vpop.f32.mrf.mxu1 }
 0x53a   : > { %v970_v51 = vmax.f32 %v964_v50, 0.0  ;;  %v966_v24 = vadd.f32 %v965_v21, %v918_v26 }
 0x53b   : > { %v967_v28 = vpop.f32.mrf.mxu1 }
 0x53c   : > { %v978_v53 = vmul.f32 %v976_v52, %v970_v51  ;;  %v971_v30 = vmax.f32 %v966_v24, 0.0 }
 0x53d   : > { %v968_v56 = vpop.f32.mrf.mxu1 }
 0x53e   : > { %v980_v57 = vrot.slane %v978_v53, 4  ;;  %v979_v58 = vmul.f32 %v976_v52, %v971_v30 }
 0x540   : > { %v981_v59 = vadd.f32 %v980_v57, %v978_v53  ;;  %v986_v0 = vrot.slane %v979_v58, 4 }
 0x542   : > { %v982_v60 = vrot.slane %v981_v59, 2  ;;  %v987_v31 = vadd.f32 %v986_v0, %v979_v58 }
 0x544   : > { %v983_v32 = vadd.f32 %v982_v60, %v981_v59  ;;  %v988_v62 = vrot.slane %v987_v31, 2 }
 0x546   : > { %v984_v3 = vrot.slane %v983_v32, 1  ;;  %v989_v5 = vadd.f32 %v988_v62, %v987_v31 }
 0x548   : > { %v985_v6 = vadd.f32 %v984_v3, %v983_v32  ;;  %v990_v7 = vrot.slane %v989_v5, 1 }
 0x54a   : > { %v991_v11 = vadd.f32 %v990_v7, %v989_v5  ;;  %v999_v46 = vadd.f32 %v997_v12, %v985_v6 }
 0x54c   : > { %v1000_v35 = vadd.f32 %v997_v12, %v991_v11 }
 0x54e   : > { %v1003_v29 = vcombine.low %v999_v46, %v1000_v35 }
 0x550   : > { %v1010_v14 = vrot.slane %v1003_v29, %v1009_v39 }
 0x552   : > { %v1017_v16 = vrot.slane %v1010_v14, %v1009_v39 }
 0x554   : > { %1023 = vst.msk [vmem:[%s284_s12] sm:$0x3] %vm1021_vm11, %v1017_v16 }
 0x555   : > { %1310 = shalt.err (!%p1307_p0)
}
 0x556   : > { %s1311_s27 = scalar_lea.hbm %s1037_s11, 32  ;;  %s1315_s16 = scalar_lea.hbm %s1903_s6, 64 }
 0x557   : > { %p1312_p5 = scmp.ne.s32.totalorder %s1037_s11, %s1311_s27  ;;  %p1316_p4 = scmp.lt.s32.totalorder %s1037_s11, %s1903_s6 }
 0x558   : > { %p1317_p6 = scmp.lt.s32.totalorder %s1315_s16, %s1311_s27 }
 0x559   : > { %p1313_p9 = pnand %p1312_p5, %p1919_p11 }
 0x55a   : > { %p1318_p8 = por %p1317_p6, %p1316_p4 }
 0x55b   : > { %p1314_p1 = pneg %p1313_p9 }
 0x55d   : > { %p1319_p3 = pnand %p1318_p8, %p1314_p1 }
 0x55f   : > { %1322 = shalt.err (!%p1319_p3)
}
 0x560   : > { %1164 = dma.vmem_to_hbm [thread:$0]  (%p1919_p11), %s1040_s10, 32, %s1037_s11, %s1025_s13  }
 0x561 PF: > { %s1051_s12 = sand.u32 1, %s1353_s21   ;;  %p1920_p7 = scmp.ne.s32.totalorder %s1909_s28, 0 }
 0x562   : > { %p1921_p12 = scmp.ge.s32.totalorder %s1365_s24, 2  ;;  %s1052_s30 = scalar_lea.sflag [#allocation5], %s1051_s12 }
 0x564   : > { %p1175_p10 = pnand %p1921_p12, %p1920_p7 }
 0x566   : > { %p1176_p2 = pneg %p1175_p10 }
 0x568   : > { %1348 = dma.done.wait (%p1176_p2), %s1052_s30, 32  }
 0x569   : > { %1350 = vsyncadd (%p1176_p2), %s1052_s30, 4294967264  ;;  %p20_p13 = scmp.ge.s32.totalorder %s1473_s9, 4   ;;  %s1922_s21 = smov %s1357_s22 }
 0x56a   : > { %s1923_s22 = smov %s1361_s23  ;;  %s1924_s23 = smov %s1490_s17 }
 0x56b   : > { %s1925_s24 = smov %s1473_s9  ;;  %22 = sbr.rel (!%p20_p13) target bundleno = 6 (0x6), region = 99 }
 0x570   :  { %1057 = vsyncpa [#allocation4], 1 }
 0x571   :  { %1059 = vsyncpa [#allocation4 + $0x1], 1 }
 0x572   :  { %1060 = vsyncpa [#allocation7], 1 }
 0x573   :  { %1061 = vsyncpa [#allocation5], 1 }
 0x574   :  { %1063 = vsyncpa [#allocation5 + $0x1], 1 }

</bundles_post_ra>
